<compile_context>
chip_gen: v7x
topology: tpu7x:2x2x1
jax: 0.10.0
libtpu: 0.0.40
codegen_flags: <defaults>
</compile_context>

<pallas_src>
import functools
import math

import jax
import jax.numpy as jnp
from jax.experimental import pallas as pl
from jax.experimental.pallas import tpu as pltpu


_LANE = 128      # vreg lane width  (last dim granule)
_SUBLANE = 8     # vreg sublane width (second-to-last dim granule)


def _round_up(x, m):
    return ((x + m - 1) // m) * m


def _make_fused_mlp_kernel(n_layers):
    """Kernel args: x_ref, w0, b0, w1, b1, ..., w_{L-1}, b_{L-1}, o_ref.

    Every layer's matmul + bias + tanh is chained inside one kernel body
    (static Python loop over the fixed layer count); intermediate activations
    live only in VMEM / vregs.
    """
    def kernel(x_ref, *refs):
        o_ref = refs[-1]
        h = x_ref[...]                                      # (tb, IN0_pad) f32
        for l in range(n_layers):
            wt = refs[2 * l][...]                           # (IN_pad, OUT_pad), pre-transposed
            b = refs[2 * l + 1][...]                        # (1, OUT_pad)
            acc = jnp.dot(h, wt, preferred_element_type=jnp.float32)
            h = jnp.tanh(acc + b)                           # bias + tanh in f32
        o_ref[...] = h.astype(o_ref.dtype)
    return kernel


def fused_mlp_forward(x, padded_params, out_features):
    """y = tanh(... tanh(x @ W0^T + b0) ... @ W_{L-1}^T + b_{L-1}), one pallas_call."""
    B, in_features = x.shape
    n_layers = len(padded_params)
    in_pad = padded_params[0][0].shape[0]
    out_pad = padded_params[-1][0].shape[1]

    # Batch tiling: pad to the sublane granule; for big batches use 128-row
    # tiles so the grid pipelines and (on v7x) shards across both TensorCores.
    if B <= _LANE:
        B_pad = _round_up(B, _SUBLANE)
        tb = B_pad
    else:
        B_pad = _round_up(B, _LANE)
        tb = _LANE

    x_pad = jnp.zeros((B_pad, in_pad), x.dtype).at[:B, :in_features].set(x)

    # Conservative VMEM budget guard: the fused kernel keeps all padded weights
    # plus one batch tile of activations resident in VMEM (safe on v5e/v6e/v7x).
    weight_bytes = sum(w.size * w.dtype.itemsize + b.size * b.dtype.itemsize
                       for w, b in padded_params)
    act_bytes = 2 * tb * max(p[0].shape[1] for p in padded_params) * 4
    if weight_bytes + act_bytes > 16 * 1024 * 1024:
        # TODO(synk): add a K/N-tiled accumulator grid (f32 VMEM scratch,
        # @pl.when init/finalize) for production-size layer widths.
        raise ValueError("MLP too large for the fully-fused VMEM-resident kernel")

    in_specs = [pl.BlockSpec((tb, in_pad), lambda i: (i, 0))]
    flat_params = []
    for wt, b in padded_params:
        in_specs.append(pl.BlockSpec(wt.shape, lambda i: (0, 0)))   # full weight block
        in_specs.append(pl.BlockSpec(b.shape, lambda i: (0, 0)))    # full bias block
        flat_params.extend((wt, b))

    y_pad = pl.pallas_call(
        _make_fused_mlp_kernel(n_layers),
        out_shape=jax.ShapeDtypeStruct((B_pad, out_pad), x.dtype),
        grid_spec=pl.GridSpec(
            grid=(B_pad // tb,),
            in_specs=in_specs,
            out_specs=pl.BlockSpec((tb, out_pad), lambda i: (i, 0)),
        ),
        compiler_params=pltpu.CompilerParams(
            dimension_semantics=("parallel",)),
    )(x_pad, *flat_params)

    return y_pad[:B, :out_features]


class MLPPallas:
    """Mirror of the PyTorch MLP: Linear + tanh for every layer (incl. last)."""

    def __init__(self, neuron_layers, key):
        if len(neuron_layers) < 2:
            raise ValueError(
                "At least input and output layer sizes must be specified")
        self.neuron_layers = list(neuron_layers)
        self.params = []          # PyTorch layout, for the reference check
        self.padded_params = []   # pre-transposed + zero-padded, used by the kernel
        for i in range(len(neuron_layers) - 1):
            fan_in, fan_out = neuron_layers[i], neuron_layers[i + 1]
            key, kw, kb = jax.random.split(key, 3)
            # deterministic init mirroring nn.Linear's U(-1/sqrt(fan_in), +)
            bound = 1.0 / math.sqrt(fan_in)
            w = jax.random.uniform(kw, (fan_out, fan_in), jnp.float32,
                                   -bound, bound)
            b = jax.random.uniform(kb, (fan_out,), jnp.float32, -bound, bound)
            self.params.append((w, b))

            in_pad = _round_up(fan_in, _LANE)
            out_pad = _round_up(fan_out, _LANE)
            wt_pad = (jnp.zeros((in_pad, out_pad), jnp.float32)
                      .at[:fan_in, :fan_out].set(w.T))            # transpose once
            b_pad = (jnp.zeros((1, out_pad), jnp.float32)
                     .at[0, :fan_out].set(b))
            self.padded_params.append((wt_pad, b_pad))

    @functools.partial(jax.jit, static_argnums=0)
    def __call__(self, x):
        return fused_mlp_forward(x, self.padded_params, self.neuron_layers[-1])


def _reference_forward(params, x):
    for w, b in params:
        x = jnp.tanh(x @ w.T + b)
    return x


if __name__ == "__main__":
    key = jax.random.PRNGKey(0)
    k_model, k_x = jax.random.split(key)

    neuron_layers = [32, 64, 16]   # input=32, hidden=64, output=16
    batch = 8

    model = MLPPallas(neuron_layers, k_model)
    x = jax.random.normal(k_x, (batch, neuron_layers[0]), jnp.float32)

    y = model(x)
    jax.block_until_ready(y)

    y_ref = _reference_forward(model.params, x)
    assert y.shape == (batch, neuron_layers[-1])
    assert jnp.allclose(y, y_ref, atol=1e-5, rtol=1e-5), "mismatch vs reference"

    print("KERNEL_OK")
</pallas_src>

<mosaic_0001>
module attributes {stable_mosaic.version = 11 : i64} {
  func.func @kernel(%arg0: i32, %arg1: memref<8x128xf32, #tpu.memory_space<vmem>>, %arg2: memref<128x128xf32, #tpu.memory_space<vmem>>, %arg3: memref<1x128xf32, #tpu.memory_space<vmem>>, %arg4: memref<128x128xf32, #tpu.memory_space<vmem>>, %arg5: memref<1x128xf32, #tpu.memory_space<vmem>>, %arg6: memref<8x128xf32, #tpu.memory_space<vmem>>) attributes {dimension_semantics = [#tpu.dimension_semantics<parallel>], iteration_bounds = array<i64: 1>, scalar_prefetch = 0 : i64, scratch_operands = 0 : i64, tpu.core_type = #tpu.core_type<tc>, window_params = [{transform_indices = @transform_0, window_bounds = array<i64: 8, 128>}, {pipeline_mode = #tpu.pipeline_mode<synchronous>, transform_indices = @transform_1, window_bounds = array<i64: 128, 128>}, {pipeline_mode = #tpu.pipeline_mode<synchronous>, transform_indices = @transform_2, window_bounds = array<i64: 1, 128>}, {pipeline_mode = #tpu.pipeline_mode<synchronous>, transform_indices = @transform_3, window_bounds = array<i64: 128, 128>}, {pipeline_mode = #tpu.pipeline_mode<synchronous>, transform_indices = @transform_4, window_bounds = array<i64: 1, 128>}, {transform_indices = @transform_5, window_bounds = array<i64: 8, 128>}]} {
    %c0 = arith.constant 0 : index
    %c0_0 = arith.constant 0 : index
    %0 = vector.load %arg1[%c0, %c0_0] : memref<8x128xf32, #tpu.memory_space<vmem>>, vector<8x128xf32>
    %c0_1 = arith.constant 0 : index
    %c0_2 = arith.constant 0 : index
    %1 = vector.load %arg2[%c0_1, %c0_2] : memref<128x128xf32, #tpu.memory_space<vmem>>, vector<128x128xf32>
    %c0_3 = arith.constant 0 : index
    %c0_4 = arith.constant 0 : index
    %2 = vector.load %arg3[%c0_3, %c0_4] : memref<1x128xf32, #tpu.memory_space<vmem>>, vector<1x128xf32>
    %cst = arith.constant dense<0.000000e+00> : vector<8x128xf32>
    %3 = tpu.matmul %0, %1, %cst {dimension_numbers = #tpu.dot_dimension_numbers<[1], [0], [0], [1], [0, 0, 1, 1], [], []>} : vector<8x128xf32>, vector<128x128xf32>, vector<8x128xf32> -> vector<8x128xf32>
    %4 = vector.broadcast %2 : vector<1x128xf32> to vector<8x128xf32>
    %5 = arith.addf %3, %4 : vector<8x128xf32>
    %6 = math.tanh %5 : vector<8x128xf32>
    %c0_5 = arith.constant 0 : index
    %c0_6 = arith.constant 0 : index
    %7 = vector.load %arg4[%c0_5, %c0_6] : memref<128x128xf32, #tpu.memory_space<vmem>>, vector<128x128xf32>
    %c0_7 = arith.constant 0 : index
    %c0_8 = arith.constant 0 : index
    %8 = vector.load %arg5[%c0_7, %c0_8] : memref<1x128xf32, #tpu.memory_space<vmem>>, vector<1x128xf32>
    %cst_9 = arith.constant dense<0.000000e+00> : vector<8x128xf32>
    %9 = tpu.matmul %6, %7, %cst_9 {dimension_numbers = #tpu.dot_dimension_numbers<[1], [0], [0], [1], [0, 0, 1, 1], [], []>} : vector<8x128xf32>, vector<128x128xf32>, vector<8x128xf32> -> vector<8x128xf32>
    %10 = vector.broadcast %8 : vector<1x128xf32> to vector<8x128xf32>
    %11 = arith.addf %9, %10 : vector<8x128xf32>
    %12 = math.tanh %11 : vector<8x128xf32>
    %c0_10 = arith.constant 0 : index
    %c0_11 = arith.constant 0 : index
    %13 = vector.load %arg6[%c0_10, %c0_11] : memref<8x128xf32, #tpu.memory_space<vmem>>, vector<8x128xf32>
    tpu.vector_store %arg6[%c0_10, %c0_11], %12 {strides = array<i32>} : memref<8x128xf32, #tpu.memory_space<vmem>>, vector<8x128xf32>,
    return
  }
  func.func @transform_0(%arg0: i32) -> (i32, i32) {
    %c0_i32 = arith.constant 0 : i32
    %c0_i32_0 = arith.constant 0 : i32
    return %arg0, %c0_i32 : i32, i32
  }
  func.func @transform_1(%arg0: i32) -> (i32, i32) {
    %c0_i32 = arith.constant 0 : i32
    %c0_i32_0 = arith.constant 0 : i32
    %c0_i32_1 = arith.constant 0 : i32
    return %c0_i32, %c0_i32_0 : i32, i32
  }
  func.func @transform_2(%arg0: i32) -> (i32, i32) {
    %c0_i32 = arith.constant 0 : i32
    %c0_i32_0 = arith.constant 0 : i32
    %c0_i32_1 = arith.constant 0 : i32
    return %c0_i32, %c0_i32_0 : i32, i32
  }
  func.func @transform_3(%arg0: i32) -> (i32, i32) {
    %c0_i32 = arith.constant 0 : i32
    %c0_i32_0 = arith.constant 0 : i32
    %c0_i32_1 = arith.constant 0 : i32
    return %c0_i32, %c0_i32_0 : i32, i32
  }
  func.func @transform_4(%arg0: i32) -> (i32, i32) {
    %c0_i32 = arith.constant 0 : i32
    %c0_i32_0 = arith.constant 0 : i32
    %c0_i32_1 = arith.constant 0 : i32
    return %c0_i32, %c0_i32_0 : i32, i32
  }
  func.func @transform_5(%arg0: i32) -> (i32, i32) {
    %c0_i32 = arith.constant 0 : i32
    %c0_i32_0 = arith.constant 0 : i32
    return %arg0, %c0_i32 : i32, i32
  }
}

</mosaic_0001>

<bundles_post_ra>
// kernel: a_call__.1
= control target key start
LH: loop header
LB: loop body
LE: loop exit
PB: predicated region body
PF: predicated region fallthrough
CT: control target
= control target key end

     0   :  { %10 = vsyncpa [#allocation3], 0  ;;  %s592_s0 = inlined_call_operand.vmem [shape: f32[8,128], index: 0, kind: input, shape index: {}]   ;;  %s593_s1 = inlined_call_operand.hbm [shape: f32[128,128], index: 1, kind: input, shape index: {}]   ;;  %s594_s2 = inlined_call_operand.vmem [shape: f32[1,128], index: 2, kind: input, shape index: {}]   ;;  %s595_s3 = inlined_call_operand.hbm [shape: f32[128,128], index: 3, kind: input, shape index: {}]   ;;  %s596_s4 = inlined_call_operand.vmem [shape: f32[1,128], index: 4, kind: input, shape index: {}]   ;;  %s597_s5 = inlined_call_operand.hbm [shape: f32[8,128], index: 5, kind: output, shape index: {}]  }
   0x1   :  { %11 = vsyncpa [#allocation6], 0 }
   0x2   :  { %12 = vsyncpa [#allocation4], 0  ;;  %s493_s18 = smov [#allocation2]   ;;  %s421_s22 = scalar_lea.hbm %s593_s1, 2048 }
   0x3   :  { %s20_s19 = sshll.u32 %s493_s18, 4  ;;  %p422_p0 = scmp.ne.s32.totalorder %s593_s1, %s421_s22  ;;  %s21_s19 = int_to_ptr.vmem [resolvable:$true] %s20_s19 }
   0x4   :  { %p425_p1 = scmp.lt.u32.totalorder %s421_s22, %s593_s1 }
   0x6   :  { %p427_p2 = pnand %p425_p1, %p422_p0 }
   0x8   :  { %430 = shalt.err (!%p427_p2)
}
   0x9   :  { %s431_s27 = scalar_lea.vmem %s21_s19, 2048  ;;  %p436_p4 = scmp.lt.s32.totalorder %s21_s19, %s21_s19 }
   0xa   :  { %p432_p3 = scmp.ne.s32.totalorder %s21_s19, %s431_s27  ;;  %p437_p5 = scmp.lt.s32.totalorder %s431_s27, %s431_s27 }
   0xc   :  { %p438_p6 = por %p437_p5, %p436_p4 }
   0xe   :  { %p439_p7 = pnand %p438_p6, %p432_p3 }
  0x10   :  { %442 = shalt.err (!%p439_p7)
}
  0x11   :  { %s494_s28 = smov 128   ;;  %s495_s29 = smov 8  }
  0x12   :  { %26 = dma.hbm_to_vmem [thread:$0]  %s593_s1, 2048, %s21_s19, [#allocation3], %s494_s28, %s494_s28, %s495_s29  }
  0x13   :  { %s496_s7 = smov [#allocation5]   ;;  %s443_s11 = scalar_lea.hbm %s595_s3, 2048 }
  0x14   :  { %s34_s8 = sshll.u32 %s496_s7, 4  ;;  %p444_p8 = scmp.ne.s32.totalorder %s595_s3, %s443_s11  ;;  %s35_s8 = int_to_ptr.vmem [resolvable:$true] %s34_s8 }
  0x15   :  { %p447_p9 = scmp.lt.u32.totalorder %s443_s11, %s595_s3 }
  0x17   :  { %p449_p10 = pnand %p447_p9, %p444_p8 }
  0x19   :  { %452 = shalt.err (!%p449_p10)
}
  0x1a   :  { %s453_s16 = scalar_lea.vmem %s35_s8, 2048  ;;  %p458_p12 = scmp.lt.s32.totalorder %s35_s8, %s35_s8 }
  0x1b   :  { %p454_p11 = scmp.ne.s32.totalorder %s35_s8, %s453_s16  ;;  %p459_p13 = scmp.lt.s32.totalorder %s453_s16, %s453_s16 }
  0x1d   :  { %p460_p0 = por %p459_p13, %p458_p12 }
  0x1f   :  { %p461_p1 = pnand %p460_p0, %p454_p11 }
  0x21   :  { %464 = shalt.err (!%p461_p1)
}
  0x22   :  { %40 = dma.hbm_to_vmem [thread:$0]  %s595_s3, 2048, %s35_s8, [#allocation6], %s494_s28, %s494_s28, %s495_s29  }
  0x23   :  { %487 = dma.done.wait [#allocation3], 2048  }
  0x24   :  { %488 = vsyncadd [#allocation3], 4294965248 }
  0x25   :  { %489 = dma.done.wait [#allocation6], 2048  }
  0x26   :  { %490 = vsyncadd [#allocation6], 4294965248  ;;  %v497_v0 = vmov 0.0|0.0   ;;  %vm498_vm0 = vmmov 0   ;;  %v499_v1 = vmov 0.0   ;;  %v50_v2 = vld [vmem:[#allocation2] sm:$0xff] }
  0x27   :  { %361 = vmatprep.subr.bf16.mxu0 %v497_v0  ;;  %323 = vmatprep.mubr.msk.f32.mxu0 %vm498_vm0, %v499_v1  ;;  %v51_v3 = vld [vmem:[#allocation2 + $0x8] sm:$0xff]  ;;  %v52_v4 = vld [vmem:[#allocation2 + $0x10] sm:$0xff]  ;;  %v53_v6 = vld [vmem:[#allocation2 + $0x18] sm:$0xff]  ;;  %s500_s22 = smov [#allocation7]  }
  0x28   :  { %385 = vmatprep.subr.bf16.mxu1 %v497_v0  ;;  %358 = vmatprep.mubr.msk.f32.mxu1 %vm498_vm0, %v499_v1  ;;  %v362_v5 = vpack.c.bf16 %v51_v3, %v50_v2  ;;  %v365_v7 = vpack.c.bf16 %v53_v6, %v52_v4  ;;  %v54_v8 = vld [vmem:[#allocation2 + $0x20] sm:$0xff]  ;;  %v55_v9 = vld [vmem:[#allocation2 + $0x28] sm:$0xff]  ;;  %v146_v12 = vld [vmem:[#allocation5 + $0x10] sm:$0xff]  ;;  %s245_s23 = sshll.u32 %s500_s22, 4  ;;  %s246_s23 = int_to_ptr.vmem [resolvable:$true] %s245_s23 }
  0x29   :  { %v144_v10 = vld [vmem:[#allocation5] sm:$0xff]  ;;  %v145_v11 = vld [vmem:[#allocation5 + $0x8] sm:$0xff]  ;;  %v147_v13 = vld [vmem:[#allocation5 + $0x18] sm:$0xff]  ;;  %v368_v14 = vpack.c.bf16 %v55_v9, %v54_v8  ;;  %p470_p3 = scmp.lt.s32.totalorder %s246_s23, %s246_s23 }
  0x2a   :  { %363 = vmatpush3.bf16.msra.mxu0 %v362_v5  ;;  %v386_v15 = vpack.c.bf16 %v145_v11, %v144_v10  ;;  %v56_v16 = vld [vmem:[#allocation2 + $0x30] sm:$0xff]  ;;  %v57_v17 = vld [vmem:[#allocation2 + $0x38] sm:$0xff]  ;;  %v389_v18 = vpack.c.bf16 %v147_v13, %v146_v12  ;;  %v148_v19 = vld [vmem:[#allocation5 + $0x20] sm:$0xff] }
  0x2b   :  { %364 = vmatprep.subr.bf16.mxu0 %v497_v0  ;;  %v149_v20 = vld [vmem:[#allocation5 + $0x28] sm:$0xff]  ;;  %v371_v21 = vpack.c.bf16 %v57_v17, %v56_v16  ;;  %v58_v22 = vld [vmem:[#allocation2 + $0x40] sm:$0xff]  ;;  %v150_v25 = vld [vmem:[#allocation5 + $0x30] sm:$0xff] }
  0x2c   :  { %387 = vmatpush3.bf16.msra.mxu1 %v386_v15  ;;  %v59_v23 = vld [vmem:[#allocation2 + $0x48] sm:$0xff]  ;;  %v392_v24 = vpack.c.bf16 %v149_v20, %v148_v19  ;;  %v151_v26 = vld [vmem:[#allocation5 + $0x38] sm:$0xff]  ;;  %v60_v28 = vld [vmem:[#allocation2 + $0x50] sm:$0xff] }
  0x2d   :  { %388 = vmatprep.subr.bf16.mxu1 %v497_v0  ;;  %v374_v27 = vpack.c.bf16 %v59_v23, %v58_v22  ;;  %v61_v29 = vld [vmem:[#allocation2 + $0x58] sm:$0xff]  ;;  %v395_v30 = vpack.c.bf16 %v151_v26, %v150_v25  ;;  %v152_v31 = vld [vmem:[#allocation5 + $0x40] sm:$0xff]  ;;  %v153_v32 = vld [vmem:[#allocation5 + $0x48] sm:$0xff] }
  0x2e   :  { %366 = vmatpush3.bf16.msra.mxu0 %v365_v7  ;;  %v377_v33 = vpack.c.bf16 %v61_v29, %v60_v28  ;;  %v62_v34 = vld [vmem:[#allocation2 + $0x60] sm:$0xff]  ;;  %v63_v35 = vld [vmem:[#allocation2 + $0x68] sm:$0xff]  ;;  %v398_v36 = vpack.c.bf16 %v153_v32, %v152_v31  ;;  %v64_v38 = vld [vmem:[#allocation2 + $0x70] sm:$0xff] }
  0x2f   :  { %367 = vmatprep.subr.bf16.mxu0 %v497_v0  ;;  %v380_v37 = vpack.c.bf16 %v63_v35, %v62_v34  ;;  %v65_v39 = vld [vmem:[#allocation2 + $0x78] sm:$0xff]  ;;  %v49_v41 = vld [vmem:[%s592_s0] sm:$0xff]  ;;  %v154_v42 = vld [vmem:[#allocation5 + $0x50] sm:$0xff] }
  0x30   :  { %390 = vmatpush3.bf16.msra.mxu1 %v389_v18  ;;  %v383_v40 = vpack.c.bf16 %v65_v39, %v64_v38  ;;  %v155_v43 = vld [vmem:[#allocation5 + $0x58] sm:$0xff]  ;;  %v156_v45 = vld [vmem:[#allocation5 + $0x60] sm:$0xff]  ;;  %v157_v46 = vld [vmem:[#allocation5 + $0x68] sm:$0xff] }
  0x31   :  { %391 = vmatprep.subr.bf16.mxu1 %v497_v0  ;;  %v401_v44 = vpack.c.bf16 %v155_v43, %v154_v42  ;;  %v404_v47 = vpack.c.bf16 %v157_v46, %v156_v45  ;;  %v158_v48 = vld [vmem:[#allocation5 + $0x70] sm:$0xff]  ;;  %v159_v49 = vld [vmem:[#allocation5 + $0x78] sm:$0xff]  ;;  %v255_v51 = vld [vmem:[%s594_s2] ss:$0 sm:$0xff]  ;;  %s465_s2 = scalar_lea.vmem %s246_s23, 128 }
  0x32   :  { %369 = vmatpush3.bf16.msra.mxu0 %v368_v14  ;;  %v407_v50 = vpack.c.bf16 %v159_v49, %v158_v48  ;;  %v256_v56 = vld [vmem:[%s596_s4] ss:$0 sm:$0xff]  ;;  %p466_p2 = scmp.ne.s32.totalorder %s246_s23, %s465_s2  ;;  %p471_p4 = scmp.lt.s32.totalorder %s465_s2, %s465_s2 }
  0x33   :  { %370 = vmatprep.subr.bf16.mxu0 %v497_v0 }
  0x34   :  { %393 = vmatpush3.bf16.msra.mxu1 %v392_v24  ;;  %p472_p5 = por %p471_p4, %p470_p3 }
  0x35   :  { %394 = vmatprep.subr.bf16.mxu1 %v497_v0 }
  0x36   :  { %372 = vmatpush3.bf16.msra.mxu0 %v371_v21  ;;  %p473_p6 = pnand %p472_p5, %p466_p2 }
  0x37   :  { %373 = vmatprep.subr.bf16.mxu0 %v497_v0 }
  0x38   :  { %396 = vmatpush3.bf16.msra.mxu1 %v395_v30 }
  0x39   :  { %397 = vmatprep.subr.bf16.mxu1 %v497_v0 }
  0x3a   :  { %375 = vmatpush3.bf16.msra.mxu0 %v374_v27 }
  0x3b   :  { %376 = vmatprep.subr.bf16.mxu0 %v497_v0 }
  0x3c   :  { %399 = vmatpush3.bf16.msra.mxu1 %v398_v36 }
  0x3d   :  { %400 = vmatprep.subr.bf16.mxu1 %v497_v0 }
  0x3e   :  { %378 = vmatpush3.bf16.msra.mxu0 %v377_v33 }
  0x3f   :  { %379 = vmatprep.subr.bf16.mxu0 %v497_v0 }
  0x40   :  { %402 = vmatpush3.bf16.msra.mxu1 %v401_v44 }
  0x41   :  { %403 = vmatprep.subr.bf16.mxu1 %v497_v0 }
  0x42   :  { %381 = vmatpush3.bf16.msra.mxu0 %v380_v37 }
  0x43   :  { %382 = vmatprep.subr.bf16.mxu0 %v497_v0 }
  0x44   :  { %405 = vmatpush3.bf16.msra.mxu1 %v404_v47 }
  0x45   :  { %406 = vmatprep.subr.bf16.mxu1 %v497_v0 }
  0x46   :  { %384 = vmatpush3.bf16.msra.mxu0 %v383_v40 }
  0x48   :  { %408 = vmatpush3.bf16.msra.mxu1 %v407_v50 }
  0x49   :  { %324 = vmatmul.mubr.f32.vlgmr.msra.gmra.mrb[0].mxu0 %v49_v41 }
 0x11c   :  { %v139_v52 = vpop.f32.mrb[0].mxu0 }
 0x11d   :  { %v140_v53 = vadd.f32 %v255_v51, %v139_v52  ;;  %v325_v54 = vpop.f32.mrb[1].mxu0 }
 0x11f   :  { %417 = vtanh.f32 %v140_v53 }
 0x129   :  { %v418_v55 = vpop.eup %417 }
 0x12a   :  { %359 = vmatmul.mubr.f32.vlgmr.msra.gmra.mrb[0].mxu1 %v418_v55 }
 0x1fd   :  { %v233_v57 = vpop.f32.mrb[0].mxu1 }
 0x1fe   :  { %v234_v58 = vadd.f32 %v256_v56, %v233_v57  ;;  %v360_v59 = vpop.f32.mrb[1].mxu1 }
 0x200   :  { %419 = vtanh.f32 %v234_v58 }
 0x20a   :  { %v420_v60 = vpop.eup %419 }
 0x20b   :  { %238 = vst [vmem:[#allocation7] sm:$0xff] %v420_v60 }
 0x20c   :  { %476 = shalt.err (!%p473_p6)
}
 0x20d   :  { %s477_s4 = scalar_lea.hbm %s597_s5, 128 }
 0x20e   :  { %p478_p7 = scmp.ne.s32.totalorder %s597_s5, %s477_s4  ;;  %p481_p8 = scmp.lt.u32.totalorder %s477_s4, %s597_s5 }
 0x210   :  { %p483_p9 = pnand %p481_p8, %p478_p7 }
 0x212   :  { %486 = shalt.err (!%p483_p9)
}
 0x213   :  { %248 = dma.vmem_to_hbm [thread:$0]  %s246_s23, 128, %s597_s5, [#allocation4]  }
 0x214   :  { %491 = dma.done.wait [#allocation4], 128  }
 0x215   :  { %492 = vsyncadd [#allocation4], 4294967168 }
 0x216   :  { %252 = vsyncpa [#allocation3], 1 }
 0x217   :  { %253 = vsyncpa [#allocation6], 1 }
 0x218   :  { %254 = vsyncpa [#allocation4], 1 }

</bundles_post_ra>
